<compile_context>
chip_gen: v7x
topology: tpu7x:2x2x1
jax: 0.10.0
libtpu: 0.0.40
codegen_flags: <defaults>
</compile_context>

<pallas_src>
import jax
import jax.numpy as jnp
from jax.experimental import pallas as pl
from jax.experimental.pallas import tpu as pltpu


def _round_up(x, m):
    return (x + m - 1) // m * m


# ----------------------------------------------------------------------------
# Kernel
# ----------------------------------------------------------------------------
def mlp_kernel(x_ref, w1_ref, shift_ref, w2_ref, b2_ref, o_ref, acc_ref):
    k = pl.program_id(1)  # hidden-chunk ("arbitrary") axis

    @pl.when(k == 0)
    def _():
        acc_ref[...] = jnp.zeros_like(acc_ref)

    # fc1 hidden-chunk (BN already folded into W1/shift): bf16 x bf16 -> f32
    h = jnp.dot(x_ref[...].astype(jnp.bfloat16), w1_ref[...],
                preferred_element_type=jnp.float32)
    # fused bias/BN shift + ReLU (dropout is identity in eval mode)
    h = jnp.maximum(h + shift_ref[...], 0.0)
    # fc2 hidden-chunk, accumulated across the hidden grid axis (f32 acc)
    acc_ref[...] += jnp.dot(h.astype(jnp.bfloat16), w2_ref[...],
                            preferred_element_type=jnp.float32)

    @pl.when(k == pl.num_programs(1) - 1)
    def _():
        o_ref[...] = (acc_ref[...] + b2_ref[...]).astype(o_ref.dtype)


# ----------------------------------------------------------------------------
# Parameter prep: fold BN (eval) into fc1, pad to lane-dense shapes, cast bf16
# ----------------------------------------------------------------------------
def fold_and_pad_params(params):
    """Fold BN (eval) into fc1, zero-pad hidden/class dims to 128-multiples,
    cast the big weight matrices to bf16 (matmuls accumulate in f32)."""
    w1 = params["w1"] * params["scale"]                       # [in, hid]
    shift = params["b1"] * params["scale"] + params["shift"]  # [1, hid]
    w2, b2 = params["w2"], params["b2"]                       # [hid, cls], [1, cls]

    hid, cls = w2.shape
    # 128-wide padding (MXU lane width); padded columns/rows are zero so the
    # result is exact.  (256-wide padding only pays off for large hid/cls.)
    hidp, clsp = _round_up(hid, 128), _round_up(cls, 128)

    w1 = jnp.pad(w1, ((0, 0), (0, hidp - hid)))
    shift = jnp.pad(shift, ((0, 0), (0, hidp - hid)))
    w2 = jnp.pad(w2, ((0, hidp - hid), (0, clsp - cls)))
    b2 = jnp.pad(b2, ((0, 0), (0, clsp - cls)))
    return {
        "w1": w1.astype(jnp.bfloat16),
        "shift": shift,                  # f32: added to the f32 accumulator
        "w2": w2.astype(jnp.bfloat16),
        "b2": b2,                        # f32
        "cls": cls,
    }


# ----------------------------------------------------------------------------
# Tiling heuristics
# ----------------------------------------------------------------------------
def _pick_batch_tiling(n_rows):
    """Row tile: large (<=512 rows) to amortize per-grid-step overhead, with an
    even number of grid steps so v7x's two TensorCores get a balanced share of
    the 'parallel' batch axis; batch is zero-padded to steps*tn."""
    steps = max(2, pl.cdiv(n_rows, 512))
    if steps % 2:
        steps += 1
    tn = _round_up(pl.cdiv(n_rows, steps), 8)
    return tn, steps * tn


def _pick_tk(in_feats, hidp, clsp, budget_bytes=20 << 20):
    """Hidden-dim chunk: keep the per-step bf16 weight slabs (W1 column block
    + W2 row block) under a VMEM budget so large layers don't OOM v7x."""
    per_hidden_col_bytes = (in_feats + clsp) * 2   # bf16 W1 col + W2 row
    tk = hidp
    if tk * per_hidden_col_bytes > budget_bytes:
        tk = max(128, (budget_bytes // per_hidden_col_bytes) // 128 * 128)
        while tk > 128 and hidp % tk:
            tk -= 128
        tk = max(tk, 128)
    return tk


def _vmem_limit_bytes():
    """~3/4 of physical VMEM: ~96 MiB on v5e/v6e (128 MiB), ~48 MiB on v7x
    (64 MiB).  Falls back to 48 MiB (v7x-safe) if the query is unavailable."""
    cap = 64 << 20
    try:
        cap = int(pltpu.get_tpu_info().vmem_capacity_bytes)
    except Exception:
        pass
    return (cap * 3) // 4


def _spec(shape, index_map, *, single_buffer=False):
    if single_buffer:
        # Block index never changes across the grid -> one VMEM copy suffices.
        return pl.BlockSpec(shape, index_map, pipeline_mode=pl.Buffered(1))
    return pl.BlockSpec(shape, index_map)


# ----------------------------------------------------------------------------
# Forward wrapper
# ----------------------------------------------------------------------------
def mlp_forward(feat, kparams, *, tn=None, tk=None):
    """feat: [N, in_feats] float32. kparams: output of fold_and_pad_params."""
    N, IN = feat.shape
    w1, shift, w2, b2 = kparams["w1"], kparams["shift"], kparams["w2"], kparams["b2"]
    cls = kparams["cls"]
    HIDP, CLSP = w2.shape

    if tn is None:
        tn, Np = _pick_batch_tiling(N)
    else:
        Np = _round_up(N, tn)
    if tk is None:
        tk = _pick_tk(IN, HIDP, CLSP)

    if Np != N:
        feat = jnp.pad(feat, ((0, Np - N), (0, 0)))   # ragged-batch padding

    batch_steps = Np // tn
    kh_steps = HIDP // tk
    weights_const = kh_steps == 1   # weight blocks constant across whole grid

    cost = pl.CostEstimate(
        flops=2 * Np * (IN * HIDP + HIDP * CLSP),
        transcendentals=0,
        bytes_accessed=(Np * IN * 4 + (IN * HIDP + HIDP * CLSP) * 2
                        + (HIDP + CLSP) * 4 + Np * CLSP * 4),
    )

    out_padded = pl.pallas_call(
        mlp_kernel,
        out_shape=jax.ShapeDtypeStruct((Np, CLSP), feat.dtype),
        grid_spec=pltpu.PrefetchScalarGridSpec(
            num_scalar_prefetch=0,
            grid=(batch_steps, kh_steps),
            in_specs=[
                # x row tile (streamed per batch step; block index constant in
                # k so it is DMA'd once per row tile)
                pl.BlockSpec((tn, IN), lambda i, k: (i, 0)),
                # W1 column chunk (bf16, BN-folded)
                _spec((IN, tk), lambda i, k: (0, k), single_buffer=weights_const),
                # folded bias/BN shift chunk
                _spec((1, tk), lambda i, k: (0, k), single_buffer=weights_const),
                # W2 row chunk (bf16)
                _spec((tk, CLSP), lambda i, k: (k, 0), single_buffer=weights_const),
                # b2 (always constant-index)
                _spec((1, CLSP), lambda i, k: (0, 0), single_buffer=True),
            ],
            out_specs=pl.BlockSpec((tn, CLSP), lambda i, k: (i, 0)),
            scratch_shapes=[pltpu.VMEM((tn, CLSP), jnp.float32)],
        ),
        compiler_params=pltpu.CompilerParams(
            dimension_semantics=("parallel", "arbitrary"),
            vmem_limit_bytes=_vmem_limit_bytes(),
        ),
        cost_estimate=cost,
    )(feat, w1, shift, w2, b2)

    if Np != N or CLSP != cls:
        # NOTE: consumers that can ignore padded rows/columns (argmax / loss
        # over the first `cls` logits) can take the padded buffer directly and
        # skip this extra HBM round trip.
        return out_padded[:N, :cls]
    return out_padded


# ----------------------------------------------------------------------------
# Deterministic params + pure-JAX f32 reference
# ----------------------------------------------------------------------------
def make_params(key, in_feats, n_hidden, num_classes, eps=1e-5):
    k1, k2, k3, k4, k5, k6 = jax.random.split(key, 6)
    # nn.Linear stores weight as [out, in]; pre-transpose to [in, out].
    w1_t = jax.random.normal(k1, (n_hidden, in_feats), jnp.float32) * 0.05
    b1 = jax.random.normal(k2, (n_hidden,), jnp.float32) * 0.05
    w2_t = jax.random.normal(k3, (num_classes, n_hidden), jnp.float32) * 0.05
    b2 = jax.random.normal(k4, (num_classes,), jnp.float32) * 0.05
    # BatchNorm1d params / running stats (deterministic).
    gamma = jnp.ones((n_hidden,), jnp.float32)
    beta = jnp.zeros((n_hidden,), jnp.float32)
    running_mean = jax.random.normal(k5, (n_hidden,), jnp.float32) * 0.1
    running_var = jax.nn.softplus(jax.random.normal(k6, (n_hidden,), jnp.float32)) + 0.5

    scale = gamma / jnp.sqrt(running_var + eps)
    shift = beta - running_mean * scale

    return {
        "w1": w1_t.T,                      # [in, hidden]
        "b1": b1.reshape(1, n_hidden),
        "scale": scale.reshape(1, n_hidden),
        "shift": shift.reshape(1, n_hidden),
        "w2": w2_t.T,                      # [hidden, classes]
        "b2": b2.reshape(1, num_classes),
    }


def mlp_reference(feat, params):
    h = feat @ params["w1"] + params["b1"]
    h = h * params["scale"] + params["shift"]
    h = jnp.maximum(h, 0.0)
    return h @ params["w2"] + params["b2"]


if __name__ == "__main__":
    N, IN_FEATS, N_HIDDEN, NUM_CLASSES = 64, 128, 64, 16
    key = jax.random.PRNGKey(0)
    kx, kp = jax.random.split(key)
    feat = jax.random.normal(kx, (N, IN_FEATS), jnp.float32)
    params = make_params(kp, IN_FEATS, N_HIDDEN, NUM_CLASSES)
    kparams = fold_and_pad_params(params)   # fold BN + pad + bf16 cast, once

    out = mlp_forward(feat, kparams)
    out = jax.block_until_ready(out)

    ref = mlp_reference(feat, params)
    assert out.shape == (N, NUM_CLASSES)
    # bf16 matmul inputs with f32 accumulation -> looser tolerance than pure f32
    assert jnp.allclose(out, ref, atol=2e-2, rtol=2e-2), "mismatch vs reference"
    print("KERNEL_OK")
</pallas_src>

<mosaic_0001>
module attributes {stable_mosaic.version = 11 : i64} {
  func.func @mlp_kernel(%arg0: i32, %arg1: i32, %arg2: memref<32x128xf32, #tpu.memory_space<vmem>>, %arg3: memref<128x128xbf16, #tpu.memory_space<vmem>>, %arg4: memref<1x128xf32, #tpu.memory_space<vmem>>, %arg5: memref<128x128xbf16, #tpu.memory_space<vmem>>, %arg6: memref<1x128xf32, #tpu.memory_space<vmem>>, %arg7: memref<32x128xf32, #tpu.memory_space<vmem>>, %arg8: memref<32x128xf32, #tpu.memory_space<vmem>>) attributes {dimension_semantics = [#tpu.dimension_semantics<parallel>, #tpu.dimension_semantics<arbitrary>], iteration_bounds = array<i64: 2, 1>, scalar_prefetch = 0 : i64, scratch_operands = 1 : i64, tpu.core_type = #tpu.core_type<tc>, window_params = [{transform_indices = @transform_0, window_bounds = array<i64: 32, 128>}, {pipeline_mode = #tpu.pipeline_mode<synchronous>, transform_indices = @transform_1, window_bounds = array<i64: 128, 128>}, {pipeline_mode = #tpu.pipeline_mode<synchronous>, transform_indices = @transform_2, window_bounds = array<i64: 1, 128>}, {pipeline_mode = #tpu.pipeline_mode<synchronous>, transform_indices = @transform_3, window_bounds = array<i64: 128, 128>}, {pipeline_mode = #tpu.pipeline_mode<synchronous>, transform_indices = @transform_4, window_bounds = array<i64: 1, 128>}, {transform_indices = @transform_5, window_bounds = array<i64: 32, 128>}]} {
    %c0_i32 = arith.constant 0 : i32
    %0 = arith.cmpi eq, %arg1, %c0_i32 : i32
    %1 = arith.extui %0 : i1 to i32
    %c0_i32_0 = arith.constant 0 : i32
    %2 = arith.cmpi ne, %1, %c0_i32_0 : i32
    scf.if %2 {
      %cst_16 = arith.constant 0.000000e+00 : f32
      %21 = vector.broadcast %cst_16 : f32 to vector<32x128xf32>
      %c0_17 = arith.constant 0 : index
      %c0_18 = arith.constant 0 : index
      %22 = vector.load %arg8[%c0_17, %c0_18] : memref<32x128xf32, #tpu.memory_space<vmem>>, vector<32x128xf32>
      tpu.vector_store %arg8[%c0_17, %c0_18], %21 {strides = array<i32>} : memref<32x128xf32, #tpu.memory_space<vmem>>, vector<32x128xf32>,
    } else {
    }
    %c0 = arith.constant 0 : index
    %c0_1 = arith.constant 0 : index
    %3 = vector.load %arg2[%c0, %c0_1] : memref<32x128xf32, #tpu.memory_space<vmem>>, vector<32x128xf32>
    %4 = arith.truncf %3 : vector<32x128xf32> to vector<32x128xbf16>
    %c0_2 = arith.constant 0 : index
    %c0_3 = arith.constant 0 : index
    %5 = vector.load %arg3[%c0_2, %c0_3] : memref<128x128xbf16, #tpu.memory_space<vmem>>, vector<128x128xbf16>
    %cst = arith.constant dense<0.000000e+00> : vector<32x128xf32>
    %6 = tpu.matmul %4, %5, %cst {dimension_numbers = #tpu.dot_dimension_numbers<[1], [0], [0], [1], [0, 0, 1, 1], [], []>} : vector<32x128xbf16>, vector<128x128xbf16>, vector<32x128xf32> -> vector<32x128xf32>
    %c0_4 = arith.constant 0 : index
    %c0_5 = arith.constant 0 : index
    %7 = vector.load %arg4[%c0_4, %c0_5] : memref<1x128xf32, #tpu.memory_space<vmem>>, vector<1x128xf32>
    %8 = vector.broadcast %7 : vector<1x128xf32> to vector<32x128xf32>
    %9 = arith.addf %6, %8 : vector<32x128xf32>
    %cst_6 = arith.constant 0.000000e+00 : f32
    %10 = vector.broadcast %cst_6 : f32 to vector<32x128xf32>
    %11 = arith.maximumf %9, %10 : vector<32x128xf32>
    %c0_7 = arith.constant 0 : index
    %c0_8 = arith.constant 0 : index
    %12 = vector.load %arg8[%c0_7, %c0_8] : memref<32x128xf32, #tpu.memory_space<vmem>>, vector<32x128xf32>
    %13 = arith.truncf %11 : vector<32x128xf32> to vector<32x128xbf16>
    %c0_9 = arith.constant 0 : index
    %c0_10 = arith.constant 0 : index
    %14 = vector.load %arg5[%c0_9, %c0_10] : memref<128x128xbf16, #tpu.memory_space<vmem>>, vector<128x128xbf16>
    %cst_11 = arith.constant dense<0.000000e+00> : vector<32x128xf32>
    %15 = tpu.matmul %13, %14, %cst_11 {dimension_numbers = #tpu.dot_dimension_numbers<[1], [0], [0], [1], [0, 0, 1, 1], [], []>} : vector<32x128xbf16>, vector<128x128xbf16>, vector<32x128xf32> -> vector<32x128xf32>
    %16 = arith.addf %12, %15 : vector<32x128xf32>
    %c0_12 = arith.constant 0 : index
    %c0_13 = arith.constant 0 : index
    %17 = vector.load %arg8[%c0_12, %c0_13] : memref<32x128xf32, #tpu.memory_space<vmem>>, vector<32x128xf32>
    tpu.vector_store %arg8[%c0_12, %c0_13], %16 {strides = array<i32>} : memref<32x128xf32, #tpu.memory_space<vmem>>, vector<32x128xf32>,
    %c0_i32_14 = arith.constant 0 : i32
    %18 = arith.cmpi eq, %arg1, %c0_i32_14 : i32
    %19 = arith.extui %18 : i1 to i32
    %c0_i32_15 = arith.constant 0 : i32
    %20 = arith.cmpi ne, %19, %c0_i32_15 : i32
    scf.if %20 {
      %c0_16 = arith.constant 0 : index
      %c0_17 = arith.constant 0 : index
      %21 = vector.load %arg8[%c0_16, %c0_17] : memref<32x128xf32, #tpu.memory_space<vmem>>, vector<32x128xf32>
      %c0_18 = arith.constant 0 : index
      %c0_19 = arith.constant 0 : index
      %22 = vector.load %arg6[%c0_18, %c0_19] : memref<1x128xf32, #tpu.memory_space<vmem>>, vector<1x128xf32>
      %23 = vector.broadcast %22 : vector<1x128xf32> to vector<32x128xf32>
      %24 = arith.addf %21, %23 : vector<32x128xf32>
      %c0_20 = arith.constant 0 : index
      %c0_21 = arith.constant 0 : index
      %25 = vector.load %arg7[%c0_20, %c0_21] : memref<32x128xf32, #tpu.memory_space<vmem>>, vector<32x128xf32>
      tpu.vector_store %arg7[%c0_20, %c0_21], %24 {strides = array<i32>} : memref<32x128xf32, #tpu.memory_space<vmem>>, vector<32x128xf32>,
    } else {
    }
    return
  }
  func.func @transform_0(%arg0: i32, %arg1: i32) -> (i32, i32) {
    %c0_i32 = arith.constant 0 : i32
    %c0_i32_0 = arith.constant 0 : i32
    return %arg0, %c0_i32 : i32, i32
  }
  func.func @transform_1(%arg0: i32, %arg1: i32) -> (i32, i32) {
    %c0_i32 = arith.constant 0 : i32
    %c0_i32_0 = arith.constant 0 : i32
    return %c0_i32, %arg1 : i32, i32
  }
  func.func @transform_2(%arg0: i32, %arg1: i32) -> (i32, i32) {
    %c0_i32 = arith.constant 0 : i32
    %c0_i32_0 = arith.constant 0 : i32
    return %c0_i32, %arg1 : i32, i32
  }
  func.func @transform_3(%arg0: i32, %arg1: i32) -> (i32, i32) {
    %c0_i32 = arith.constant 0 : i32
    %c0_i32_0 = arith.constant 0 : i32
    return %arg1, %c0_i32 : i32, i32
  }
  func.func @transform_4(%arg0: i32, %arg1: i32) -> (i32, i32) {
    %c0_i32 = arith.constant 0 : i32
    %c0_i32_0 = arith.constant 0 : i32
    %c0_i32_1 = arith.constant 0 : i32
    return %c0_i32, %c0_i32_0 : i32, i32
  }
  func.func @transform_5(%arg0: i32, %arg1: i32) -> (i32, i32) {
    %c0_i32 = arith.constant 0 : i32
    %c0_i32_0 = arith.constant 0 : i32
    return %arg0, %c0_i32 : i32, i32
  }
}

</mosaic_0001>

<bundles_post_ra>
// kernel: tpu_custom_call.1
= control target key start
LH: loop header
LB: loop body
LE: loop exit
PB: predicated region body
PF: predicated region fallthrough
CT: control target
= control target key end

     0   :  { %10 = vsyncpa [#allocation4], 0  ;;  %s1424_s0 = inlined_call_operand.hbm [shape: f32[64,128], index: 0, kind: input, shape index: {}]   ;;  %s1425_s1 = inlined_call_operand.hbm [shape: bf16[128,128], index: 1, kind: input, shape index: {}]   ;;  %s1426_s2 = inlined_call_operand.vmem [shape: f32[1,128], index: 2, kind: input, shape index: {}]   ;;  %s1427_s3 = inlined_call_operand.hbm [shape: bf16[128,128], index: 3, kind: input, shape index: {}]   ;;  %s1428_s4 = inlined_call_operand.vmem [shape: f32[1,128], index: 4, kind: input, shape index: {}]   ;;  %s1429_s5 = inlined_call_operand.hbm [shape: f32[64,128], index: 5, kind: output, shape index: {}]  }
   0x1   :  { %12 = vsyncpa [#allocation4 + $0x1], 0 }
   0x2   :  { %13 = vsyncpa [#allocation7], 0 }
   0x3   :  { %14 = vsyncpa [#allocation5], 0 }
   0x4   :  { %16 = vsyncpa [#allocation5 + $0x1], 0  ;;  %s1153_s18 = smov 0   ;;  %s1155_s19 = smov 0  }
   0x5   :  { %s1157_s20 = smov 0   ;;  %s1159_s21 = smov 0  }
   0x6   :  { %s1161_s22 = smov 0   ;;  %s1163_s23 = smov 0  }
   0x7 LB: > { %s734_s24 = sadd.s32 4294967295, %s1111_s23   ;;  %s735_s25 = sadd.s32 4294967294, %s1111_s23   ;;  %s1111_s23 = sphi %s1163_s23, %s22_s23   ;;  %s1107_s22 = sphi %s1161_s22, %s1451_s22   ;;  %s1103_s21 = sphi %s1159_s21, %s1450_s21   ;;  %s1099_s20 = sphi %s1157_s20, %s1449_s20   ;;  %s1095_s19 = sphi %s1155_s19, %s1448_s19   ;;  %s1091_s18 = sphi %s1153_s18, %s1447_s18  }
   0x8   : > { %p54_p0 = scmp.ne.s32.totalorder %s1095_s19, %s1091_s18  ;;  %p1187_p1 = scmp.eq.s32.totalorder %s734_s24, 0 }
   0x9   : > { %p1191_p2 = scmp.eq.s32.totalorder %s734_s24, 1  ;;  %p183_p3 = scmp.eq.s32.totalorder %s735_s25, 1 }
   0xa   : > { %s1434_s26 = scalar_select %p1187_p1, 1, 0 }
   0xb   : > { %p1197_p4 = por %p1187_p1, %p54_p0  ;;  %p736_p5 = scmp.ge.s32.totalorder %s1111_s23, 1 }
   0xc   : > { %p1202_p6 = por %p183_p3, %p54_p0  ;;  %p190_p7 = scmp.lt.s32.totalorder %s1111_s23, 3 }
   0xd   : > { %s1436_s28 = scalar_select %p1197_p4, 1, 0 }
   0xe   : > { %s1437_s29 = scalar_select %p1202_p6, 1, 0 }
   0xf   : > { %p1207_p8 = pnand %p736_p5, %p190_p7  ;;  %s1113_s6 = smov [#allocation6]  }
  0x10   : > { %s204_s7 = sshll.u32 %s1113_s6, 4  ;;  %s1114_s9 = smov [#allocation8]   ;;  %s1211_s7 = int_to_ptr.vmem [resolvable:$true] %s204_s7 }
  0x11   : > { %p846_p9 = pneg %p1207_p8  ;;  %s226_s10 = sshll.u32 %s1114_s9, 4  ;;  %s1222_s10 = int_to_ptr.vmem [resolvable:$true] %s226_s10 }
  0x12   : > { %s939_s13 = scalar_lea.hbm %s1425_s1, 1024 }
  0x13   : > { %p1218_p11 = pnand %p846_p9, %p1187_p1  ;;  %p940_p12 = scmp.ne.s32.totalorder %s1425_s1, %s939_s13 }
  0x14   : > { %p946_p5 = scmp.lt.u32.totalorder %s939_s13, %s1425_s1 }
  0x15   : > { %p941_p13 = pneg %p1218_p11 }
  0x17   : > { %p942_p0 = pnand %p941_p13, %p940_p12 }
  0x19   : > { %p943_p3 = pneg %p942_p0 }
  0x1b   : > { %p948_p7 = pnand %p946_p5, %p943_p3 }
  0x1d   : > { %951 = shalt.err (!%p948_p7)
}
  0x1e   : > { %s952_s24 = scalar_lea.vmem %s1211_s7, 1024  ;;  %p960_p1 = scmp.lt.s32.totalorder %s1211_s7, %s1211_s7 }
  0x1f   : > { %p953_p9 = scmp.ne.s32.totalorder %s1211_s7, %s952_s24  ;;  %p961_p12 = scmp.lt.s32.totalorder %s952_s24, %s952_s24 }
  0x21   : > { %p955_p10 = pnand %p953_p9, %p941_p13  ;;  %p962_p0 = por %p961_p12, %p960_p1 }
  0x23   : > { %p956_p6 = pneg %p955_p10 }
  0x25   : > { %p963_p4 = pnand %p962_p0, %p956_p6 }
  0x27   : > { %966 = shalt.err (!%p963_p4)
}
  0x28   : > { %s1115_s25 = smov 64   ;;  %s1116_s6 = smov 4  }
  0x29   : > { %849 = dma.hbm_to_vmem [thread:$0]  (!%p1218_p11), %s1425_s1, 1024, %s1211_s7, [#allocation7], %s1115_s25, %s1115_s25, %s1116_s6  }
  0x2a   : > { %s967_s14 = scalar_lea.hbm %s1427_s3, 1024 }
  0x2b   : > { %p968_p1 = scmp.ne.s32.totalorder %s1427_s3, %s967_s14  ;;  %p974_p10 = scmp.lt.u32.totalorder %s967_s14, %s1427_s3 }
  0x2d   : > { %p970_p4 = pnand %p968_p1, %p941_p13 }
  0x2f   : > { %p971_p6 = pneg %p970_p4 }
  0x31   : > { %p976_p3 = pnand %p974_p10, %p971_p6 }
  0x33   : > { %979 = shalt.err (!%p976_p3)
}
  0x34   : > { %s980_s7 = scalar_lea.vmem %s1222_s10, 1024  ;;  %p988_p12 = scmp.lt.s32.totalorder %s1222_s10, %s1222_s10 }
  0x35   : > { %p981_p5 = scmp.ne.s32.totalorder %s1222_s10, %s980_s7  ;;  %p989_p0 = scmp.lt.s32.totalorder %s980_s7, %s980_s7 }
  0x37   : > { %p983_p7 = pnand %p981_p5, %p941_p13  ;;  %p990_p1 = por %p989_p0, %p988_p12 }
  0x39   : > { %p984_p9 = pneg %p983_p7 }
  0x3b   : > { %p991_p4 = pnand %p990_p1, %p984_p9 }
  0x3d   : > { %994 = shalt.err (!%p991_p4)
}
  0x3e   : > { %852 = dma.hbm_to_vmem [thread:$0]  (!%p1218_p11), %s1427_s3, 1024, %s1222_s10, [#allocation7], %s1115_s25, %s1115_s25, %s1116_s6  }
  0x3f   : > { %s34_s12 = sadd.s32 1, %s1107_s22  ;;  %s41_s13 = sadd.s32 1, %s1099_s20 }
  0x40   : > { %p36_p13 = scmp.ge.s32.totalorder %s34_s12, 2  ;;  %p48_p6 = scmp.ne.s32.totalorder %s1099_s20, %s1095_s19 }
  0x41   : > { %p49_p10 = scmp.eq.s32.totalorder %s1111_s23, 0  ;;  %p863_p3 = scmp.lt.s32.totalorder %s1111_s23, 2 }
  0x42   : > { %s1453_s12 = smov (%p36_p13, %s34_s12), 0  ;;  %p1286_p7 = por %p1191_p2, %p48_p6 }
  0x43   : > { %p50_p5 = por %p49_p10, %p48_p6  ;;  %s38_s14 = ssub.s32 %s1107_s22, %s1453_s12 }
  0x44   : > { %s1440_s8 = scalar_select %p1286_p7, 1, 0 }
  0x45   : > { %s243_s15 = sand.u32 1, %s1099_s20   ;;  %p39_p9 = scmp.eq.s32.totalorder %s38_s14, 0 }
  0x46   : > { %s741_s10 = sshll.u32 %s243_s15, 5  ;;  %s772_s25 = sshll.u32 %s1107_s22, 9 }
  0x47   : > { %s1295_s6 = scalar_select %p39_p9, %s1099_s20, %s41_s13  }
  0x48   : > { %s1300_s24 = scalar_lea.hbm %s1424_s0, %s772_s25  ;;  %s247_s27 = scalar_lea.vmem [#allocation3], %s741_s10 }
  0x49   : > { %s254_s7 = sshll.u32 %s247_s27, 4  ;;  %p1304_p2 = pnand %p863_p3, %p50_p5  ;;  %s1308_s7 = int_to_ptr.vmem [resolvable:$true] %s254_s7 }
  0x4a   : > { %s1310_s11 = scalar_lea.sflag [#allocation4], %s243_s15  ;;  %s995_s13 = scalar_lea.hbm %s1300_s24, 512 }
  0x4b   : > { %p996_p11 = scmp.ne.s32.totalorder %s1300_s24, %s995_s13  ;;  %p997_p12 = pneg %p1304_p2 }
  0x4c   : > { %s1000_s25 = scalar_lea.hbm %s1424_s0, 1024  ;;  %p1001_p4 = scmp.lt.u32.totalorder %s1300_s24, %s1424_s0 }
  0x4d   : > { %p998_p0 = pnand %p997_p12, %p996_p11  ;;  %p1002_p13 = scmp.lt.u32.totalorder %s1000_s25, %s995_s13 }
  0x4e   : > { %p1004_p10 = scmp.lt.u32.totalorder %s995_s13, %s1300_s24 }
  0x4f   : > { %p999_p1 = pneg %p998_p0  ;;  %p1003_p6 = por %p1002_p13, %p1001_p4 }
  0x51   : > { %p1005_p3 = por %p1004_p10, %p1003_p6 }
  0x53   : > { %p1006_p5 = pnand %p1005_p3, %p999_p1 }
  0x55   : > { %1009 = shalt.err (!%p1006_p5)
}
  0x56   : > { %s1010_s15 = scalar_lea.vmem %s1308_s7, 512  ;;  %s1117_s27 = smov [#allocation3]  }
  0x57   : > { %p1011_p9 = scmp.ne.s32.totalorder %s1308_s7, %s1010_s15  ;;  %s1015_s14 = sshll.u32 %s1117_s27, 4  ;;  %s1016_s14 = int_to_ptr.vmem [resolvable:$false] %s1015_s14 }
  0x58   : > { %s1017_s10 = scalar_lea.vmem %s1016_s14, 1024  ;;  %p1018_p7 = scmp.lt.s32.totalorder %s1308_s7, %s1016_s14 }
  0x59   : > { %p1013_p11 = pnand %p1011_p9, %p997_p12  ;;  %p1019_p4 = scmp.lt.s32.totalorder %s1017_s10, %s1010_s15 }
  0x5b   : > { %p1014_p0 = pneg %p1013_p11  ;;  %p1020_p13 = por %p1019_p4, %p1018_p7 }
  0x5d   : > { %p1021_p6 = pnand %p1020_p13, %p1014_p0 }
  0x5f   : > { %1024 = shalt.err (!%p1021_p6)
}
  0x60   : > { %s1118_s13 = smov 128   ;;  %s1119_s25 = smov 8  }
  0x61   : > { %856 = dma.hbm_to_vmem [thread:$0]  (!%p1304_p2), %s1300_s24, 512, %s1308_s7, %s1310_s11, %s1118_s13, %s1118_s13, %s1119_s25  }
  0x62   : > { %266 = sbr.rel (%p1207_p8) target bundleno = 596 (0x254), region = 40  ;;  %s1341_s16 = sand.u32 (!%p1207_p8), 1, %s1095_s19  }
  0x63   : > { %s745_s17 = sshll.u32 (!%p1207_p8), %s1341_s16, 5  ;;  %s269_s15 = scalar_lea.sflag (!%p1207_p8), [#allocation4], %s1341_s16 }
  0x64   : > { %s1347_s27 = scalar_lea.vmem (!%p1207_p8), [#allocation3], %s745_s17  ;;  %p1442_p7 = scmp.ne.s32.totalorder (!%p1207_p8), %s1436_s28, 0 }
  0x69   : > { %1078 = dma.done.wait (%p1442_p7), %s269_s15, 512  }
  0x6a   : > { %1080 = vsyncadd (%p1442_p7), %s269_s15, 4294966784  ;;  %p1443_p2 = scmp.ne.s32.totalorder %s1434_s26, 0 }
  0x6c   : > { %1082 = dma.done.wait (%p1443_p2), [#allocation7], 2048  }
  0x6d   : > { %1084 = vsyncadd (%p1443_p2), [#allocation7], 4294965248  ;;  %v923_v0 = vld [vmem:[#allocation6] sm:$0xff]   ;;  %v924_v1 = vld [vmem:[#allocation6 + $0x8] sm:$0xff]   ;;  %s309_s7 = scalar_lea.vmem [#allocation9], %s745_s17  ;;  %s773_s11 = sshll.u32 %s1103_s21, 9 }
  0x6e   : > { %794 = vmatprep.subr.bf16.mxu0 %v923_v0  ;;  %v925_v2 = vld [vmem:[#allocation6 + $0x10] sm:$0xff]   ;;  %v926_v3 = vld [vmem:[#allocation6 + $0x18] sm:$0xff]   ;;  %v325_v4 = vld [vmem:[%s1347_s27] sm:$0xff]  ;;  %s618_s9 = sshll.u32 %s309_s7, 4  ;;  %s1375_s13 = scalar_lea.hbm %s1429_s5, %s773_s11  ;;  %s1370_s9 = int_to_ptr.vmem [resolvable:$true] %s618_s9 }
  0x6f   : > { %795 = vmatpush3.bf16.msra.mxu0 %v923_v0  ;;  %v326_v5 = vld [vmem:[%s1347_s27 + $0x8] sm:$0xff]  ;;  %v931_v7 = vld [vmem:[#allocation8] sm:$0xff]   ;;  %v933_v10 = vld [vmem:[#allocation8 + $0x10] sm:$0xff]   ;;  %s605_s21 = scalar_lea.sflag [#allocation5], %s1341_s16  ;;  %s1025_s25 = scalar_lea.vmem %s1370_s9, 512 }
  0x70   : > { %796 = vmatprep.subr.bf16.mxu0 %v924_v1  ;;  %v329_v6 = vpack.c.bf16 %v326_v5, %v325_v4  ;;  %v932_v8 = vld [vmem:[#allocation8 + $0x8] sm:$0xff]   ;;  %v927_v9 = vld [vmem:[#allocation6 + $0x20] sm:$0xff]   ;;  %814 = vmatprep.subr.bf16.mxu1 %v931_v7  ;;  %v934_v12 = vld [vmem:[#allocation8 + $0x18] sm:$0xff]   ;;  %p1026_p8 = scmp.ne.s32.totalorder %s1370_s9, %s1025_s25  ;;  %p1444_p12 = scmp.ne.s32.totalorder %s1440_s8, 0 }
  0x71   : > { %815 = vmatpush3.bf16.msra.mxu1 %v931_v7  ;;  %v928_v11 = vld [vmem:[#allocation6 + $0x28] sm:$0xff]   ;;  %v929_v13 = vld [vmem:[#allocation6 + $0x30] sm:$0xff]   ;;  %v935_v14 = vld [vmem:[#allocation8 + $0x20] sm:$0xff]   ;;  %s1120_s17 = smov [#allocation9]  }
  0x72   : > { %810 = vmatprep.mubr.bf16.mxu0 %v329_v6  ;;  %816 = vmatprep.subr.bf16.mxu1 %v932_v8  ;;  %v930_v15 = vld [vmem:[#allocation6 + $0x38] sm:$0xff]   ;;  %v936_v16 = vld [vmem:[#allocation8 + $0x28] sm:$0xff]   ;;  %v327_v17 = vld [vmem:[%s1347_s27 + $0x10] sm:$0xff]  ;;  %p1027_p1 = pnand %p1026_p8, %p1444_p12  ;;  %s1029_s15 = sshll.u32 %s1120_s17, 4  ;;  %s1030_s15 = int_to_ptr.vmem [resolvable:$false] %s1029_s15 }
  0x73   : > { %797 = vmatpush3.bf16.msra.mxu0 %v924_v1  ;;  %v328_v18 = vld [vmem:[%s1347_s27 + $0x18] sm:$0xff]  ;;  %v937_v20 = vld [vmem:[#allocation8 + $0x30] sm:$0xff]   ;;  %v749_v22 = vld [vmem:[%s1426_s2] ss:$0 sm:$0xff]  ;;  %s1031_s27 = scalar_lea.vmem %s1030_s15, 1024  ;;  %p1032_p3 = scmp.lt.s32.totalorder %s1370_s9, %s1030_s15 }
  0x74   : > { %798 = vmatprep.subr.bf16.mxu0 %v925_v2  ;;  %v330_v19 = vpack.c.bf16 %v328_v18, %v327_v17  ;;  %v938_v21 = vld [vmem:[#allocation8 + $0x38] sm:$0xff]   ;;  %v766_v37 = vld [vmem:[%s1428_s4] ss:$0 sm:$0xff]  ;;  %p1028_p10 = pneg %p1027_p1  ;;  %p1033_p5 = scmp.lt.s32.totalorder %s1031_s27, %s1025_s25 }
  0x75   : > { %817 = vmatpush3.bf16.msra.mxu1 %v932_v8 }
  0x76   : > { %818 = vmatprep.subr.bf16.mxu1 %v933_v10  ;;  %p1034_p9 = por %p1033_p5, %p1032_p3 }
  0x77   : > { %799 = vmatpush3.bf16.msra.mxu0 %v925_v2 }
  0x78   : > { %800 = vmatprep.subr.bf16.mxu0 %v926_v3  ;;  %p1035_p11 = pnand %p1034_p9, %p1028_p10 }
  0x79   : > { %819 = vmatpush3.bf16.msra.mxu1 %v933_v10 }
  0x7a   : > { %820 = vmatprep.subr.bf16.mxu1 %v934_v12 }
  0x7b   : > { %801 = vmatpush3.bf16.msra.mxu0 %v926_v3 }
  0x7c   : > { %802 = vmatprep.subr.bf16.mxu0 %v927_v9 }
  0x7d   : > { %821 = vmatpush3.bf16.msra.mxu1 %v934_v12 }
  0x7e   : > { %822 = vmatprep.subr.bf16.mxu1 %v935_v14 }
  0x7f   : > { %803 = vmatpush3.bf16.msra.mxu0 %v927_v9 }
  0x80   : > { %804 = vmatprep.subr.bf16.mxu0 %v928_v11 }
  0x81   : > { %823 = vmatpush3.bf16.msra.mxu1 %v935_v14 }
  0x82   : > { %824 = vmatprep.subr.bf16.mxu1 %v936_v16 }
  0x83   : > { %805 = vmatpush3.bf16.msra.mxu0 %v928_v11 }
  0x84   : > { %806 = vmatprep.subr.bf16.mxu0 %v929_v13 }
  0x85   : > { %825 = vmatpush3.bf16.msra.mxu1 %v936_v16 }
  0x86   : > { %826 = vmatprep.subr.bf16.mxu1 %v937_v20 }
  0x87   : > { %807 = vmatpush3.bf16.msra.mxu0 %v929_v13 }
  0x88   : > { %808 = vmatprep.subr.bf16.mxu0 %v930_v15 }
  0x89   : > { %827 = vmatpush3.bf16.msra.mxu1 %v937_v20 }
  0x8a   : > { %828 = vmatprep.subr.bf16.mxu1 %v938_v21 }
  0x8b   : > { %809 = vmatpush3.bf16.msra.mxu0 %v930_v15 }
  0x8d   : > { %829 = vmatpush3.bf16.msra.mxu1 %v938_v21 }
  0x8e   : > { %811 = vmatmul.mubr.bf16.vlgmr.msra.gmra.mrb[0].mxu0 %v330_v19 }
 0x161   : > { %v812_v23 = vpop.f32.mrb[0].mxu0 }
 0x162   : > { %v445_v24 = vadd.f32 %v812_v23, %v749_v22  ;;  %v436_v25 = vpop.f32.mrb[1].mxu0 }
 0x163   : > { %v437_v26 = vadd.f32 %v749_v22, %v436_v25  ;;  %v813_v27 = vpop.f32.mrb[2].mxu0 }
 0x164   : > { %v448_v28 = vadd.f32 %v813_v27, %v749_v22  ;;  %v439_v29 = vpop.f32.mrb[3].mxu0  ;;  %v453_v31 = vmax.f32 %v445_v24, 0.0 }
 0x165   : > { %v440_v30 = vadd.f32 %v749_v22, %v439_v29  ;;  %v451_v33 = vmax.f32 %v437_v26, 0.0 }
 0x166   : > { %v454_v32 = vmax.f32 %v448_v28, 0.0 }
 0x167   : > { %v452_v34 = vmax.f32 %v440_v30, 0.0 }
 0x168   : > { %v460_v35 = vpack.c.bf16 %v454_v32, %v453_v31 }
 0x169   : > { %v459_v36 = vpack.c.bf16 %v452_v34, %v451_v33 }
 0x16b   : > { %830 = vmatprep.mubr.bf16.mxu1 %v459_v36 }
 0x16c   : > { %831 = vmatmul.mubr.bf16.vlgmr.msra.gmra.mrb[0].mxu1 %v460_v35 }
 0x23f   : > { %v832_v38 = vpop.f32.mrb[0].mxu1 }
 0x240   : > { %v598_v39 = vadd.f32 %v832_v38, %v766_v37  ;;  %v559_v40 = vpop.f32.mrb[1].mxu1 }
 0x241   : > { %v596_v41 = vadd.f32 %v766_v37, %v559_v40  ;;  %v833_v42 = vpop.f32.mrb[2].mxu1 }
 0x242   : > { %602 = vst [vmem:[%s309_s7 + $0x10] sm:$0xff] %v598_v39  ;;  %v599_v43 = vadd.f32 %v833_v42, %v766_v37  ;;  %v562_v44 = vpop.f32.mrb[3].mxu1 }
 0x243   : > { %600 = vst [vmem:[%s309_s7] sm:$0xff] %v596_v41  ;;  %v597_v45 = vadd.f32 %v766_v37, %v562_v44 }
 0x244   : > { %603 = vst [vmem:[%s309_s7 + $0x18] sm:$0xff] %v599_v43 }
 0x245   : > { %601 = vst [vmem:[%s309_s7 + $0x8] sm:$0xff] %v597_v45 }
 0x246   : > { %1038 = shalt.err (!%p1035_p11)
}
 0x247   : > { %s1039_s26 = scalar_lea.hbm %s1375_s13, 512  ;;  %s1043_s24 = scalar_lea.hbm %s1429_s5, 1024 }
 0x248   : > { %p1040_p0 = scmp.ne.s32.totalorder %s1375_s13, %s1039_s26  ;;  %p1044_p6 = scmp.lt.u32.totalorder %s1375_s13, %s1429_s5 }
 0x249   : > { %p1045_p7 = scmp.lt.u32.totalorder %s1043_s24, %s1039_s26  ;;  %p1047_p8 = scmp.lt.u32.totalorder %s1039_s26, %s1375_s13 }
 0x24a   : > { %p1041_p4 = pnand %p1040_p0, %p1444_p12 }
 0x24b   : > { %p1046_p2 = por %p1045_p7, %p1044_p6 }
 0x24c   : > { %p1042_p13 = pneg %p1041_p4 }
 0x24d   : > { %p1048_p1 = por %p1047_p8, %p1046_p2 }
 0x24f   : > { %p1049_p10 = pnand %p1048_p1, %p1042_p13 }
 0x251   : > { %1052 = shalt.err (!%p1049_p10)
}
 0x252   : > { %s1121_s14 = smov 128   ;;  %s1122_s10 = smov 8  }
 0x253   : > { %844 = dma.vmem_to_hbm [thread:$0]  (%p1444_p12), %s1370_s9, 512, %s1375_s13, %s605_s21, %s1121_s14, %s1121_s14, %s1122_s10  }
 0x254 PF: > { %s633_s25 = sand.u32 1, %s1091_s18   ;;  %p1445_p3 = scmp.ne.s32.totalorder %s1437_s29, 0 }
 0x255   : > { %p1446_p5 = scmp.ge.s32.totalorder %s1111_s23, 2  ;;  %s634_s17 = scalar_lea.sflag [#allocation5], %s633_s25 }
 0x257   : > { %p858_p9 = pnand %p1446_p5, %p1445_p3 }
 0x259   : > { %1086 = dma.done.wait (!%p858_p9), %s634_s17, 512  }
 0x25a   : > { %1088 = vsyncadd (!%p858_p9), %s634_s17, 4294966784  ;;  %s22_s23 = sadd.s32 1, %s1111_s23   ;;  %s1447_s18 = smov %s1095_s19 }
 0x25b   : > { %p19_p11 = scmp.ge.s32.totalorder %s22_s23, 4   ;;  %s1448_s19 = smov %s1099_s20 }
 0x25c   : > { %s1449_s20 = smov %s1295_s6  ;;  %s1450_s21 = smov %s1107_s22 }
 0x25d   : > { %s1451_s22 = smov %s1453_s12  ;;  %21 = sbr.rel (!%p19_p11) target bundleno = 7 (0x7), region = 106 }
 0x264   :  { %639 = vsyncpa [#allocation4], 1 }
 0x265   :  { %641 = vsyncpa [#allocation4 + $0x1], 1 }
 0x266   :  { %642 = vsyncpa [#allocation7], 1 }
 0x267   :  { %643 = vsyncpa [#allocation5], 1 }
 0x268   :  { %645 = vsyncpa [#allocation5 + $0x1], 1 }

</bundles_post_ra>
